<compile_context>
chip_gen: v7x
topology: tpu7x:2x2x1
jax: 0.10.0
libtpu: 0.0.40
codegen_flags: <defaults>
</compile_context>

<pallas_src>
import functools

import numpy as np
import jax
import jax.numpy as jnp
from jax.experimental import pallas as pl
from jax.experimental.pallas import tpu as pltpu

# ---------------- shapes implied by the module / its use in transformer.py ----------------
B = 2      # batch
S = 8      # sequence length
D = 32     # num_features (normalized feature dimension)
EPS = 1e-6

# Rows per grid step when the problem is large enough to need tiling.
# (ROW_TILE, D) f32 in + out, double-buffered, is a few hundred KiB for typical D --
# comfortably inside v7x's 32 MiB default scoped VMEM.
ROW_TILE = 1024


def layernorm_kernel(x_ref, gb_ref, o_ref, *, eps):
    """Normalize every row of the (TR, D) tile along the last (feature) axis."""
    x = x_ref[...].astype(jnp.float32)          # (TR, D)
    gamma = gb_ref[0:1, :].astype(jnp.float32)  # (1, D) static slice of packed params
    beta = gb_ref[1:2, :].astype(jnp.float32)   # (1, D)

    d = x.shape[-1]
    mean = jnp.mean(x, axis=-1, keepdims=True)                       # (TR, 1)
    xc = x - mean
    # torch.std default is unbiased: divide by (D - 1)
    var = jnp.sum(xc * xc, axis=-1, keepdims=True) * (1.0 / (d - 1))
    denom = jnp.sqrt(var) + eps                                      # eps added to the std

    # Exact divide (broadcast along the feature axis); keeps bit-level parity with the
    # reference formula.  The divide is not the bottleneck at any realistic size.
    o_ref[...] = (gamma * xc / denom + beta).astype(o_ref.dtype)


def layer_norm(x, gamma, beta, *, eps=EPS, row_tile=ROW_TILE):
    """x: (..., D); gamma/beta: (D,).  Returns same shape/dtype as x."""
    orig_shape = x.shape
    d = orig_shape[-1]
    rows = int(np.prod(orig_shape[:-1]))

    x2 = x.reshape(rows, d)                       # flatten leading dims -> row-major rows
    gb = jnp.stack([gamma, beta], axis=0)         # pack the two tiny params into one input
    kernel = functools.partial(layernorm_kernel, eps=eps)

    if rows <= row_tile:
        # Small problem: single whole-array block, NO grid -> no software-pipeline
        # scaffolding, no index maps, minimal launch cost.
        out2 = pl.pallas_call(
            kernel,
            out_shape=jax.ShapeDtypeStruct((rows, d), x.dtype),
            in_specs=[
                pl.BlockSpec(memory_space=pltpu.VMEM),   # x, whole array
                pl.BlockSpec(memory_space=pltpu.VMEM),   # packed gamma/beta
            ],
            out_specs=pl.BlockSpec(memory_space=pltpu.VMEM),
        )(x2, gb)
    else:
        # Large problem: tile over rows; each grid step normalizes an independent
        # (row_tile, D) slab.  Parallel semantics lets v7x shard steps across its 2 TCs.
        pad = (-rows) % row_tile
        if pad:
            x2 = jnp.pad(x2, ((0, pad), (0, 0)))  # padded rows are computed then dropped
        padded_rows = rows + pad
        out2 = pl.pallas_call(
            kernel,
            out_shape=jax.ShapeDtypeStruct((padded_rows, d), x.dtype),
            grid=(padded_rows // row_tile,),
            in_specs=[
                pl.BlockSpec((row_tile, d), lambda i: (i, 0)),   # x row tile
                pl.BlockSpec((2, d), lambda i: (0, 0)),          # packed gamma/beta
            ],
            out_specs=pl.BlockSpec((row_tile, d), lambda i: (i, 0)),
            compiler_params=pltpu.CompilerParams(
                dimension_semantics=("parallel",)),
        )(x2, gb)
        out2 = out2[:rows]

    return out2.reshape(orig_shape)


# ---------------- pure-JAX reference (torch-exact semantics) ----------------
def reference(x, gamma, beta, eps=EPS):
    mean = jnp.mean(x, axis=-1, keepdims=True)
    var = jnp.sum((x - mean) ** 2, axis=-1, keepdims=True) / (x.shape[-1] - 1)
    std = jnp.sqrt(var)
    return gamma * (x - mean) / (std + eps) + beta


if __name__ == "__main__":
    key = jax.random.PRNGKey(0)
    k1, k2, k3 = jax.random.split(key, 3)

    x = jax.random.normal(k1, (B, S, D), jnp.float32)
    gamma = 1.0 + 0.1 * jax.random.normal(k2, (D,), jnp.float32)   # a_2
    beta = 0.1 * jax.random.normal(k3, (D,), jnp.float32)          # b_2

    out = layer_norm(x, gamma, beta)
    out = jax.block_until_ready(out)

    ref = reference(x, gamma, beta)
    np.testing.assert_allclose(np.asarray(out), np.asarray(ref), rtol=1e-5, atol=1e-5)

    print("KERNEL_OK")
</pallas_src>

<mosaic_0001>
module attributes {stable_mosaic.version = 11 : i64} {
  func.func @layernorm_kernel(%arg0: memref<16x32xf32, #tpu.memory_space<vmem>>, %arg1: memref<2x32xf32, #tpu.memory_space<vmem>>, %arg2: memref<16x32xf32, #tpu.memory_space<vmem>>) attributes {dimension_semantics = [], scalar_prefetch = 0 : i64, scratch_operands = 0 : i64, tpu.core_type = #tpu.core_type<tc>} {
    %c0 = arith.constant 0 : index
    %c0_0 = arith.constant 0 : index
    %0 = vector.load %arg0[%c0, %c0_0] : memref<16x32xf32, #tpu.memory_space<vmem>>, vector<16x32xf32>
    %c0_1 = arith.constant 0 : index
    %c0_2 = arith.constant 0 : index
    %1 = vector.load %arg1[%c0_1, %c0_2] : memref<2x32xf32, #tpu.memory_space<vmem>>, vector<1x32xf32>
    %c1 = arith.constant 1 : index
    %c0_3 = arith.constant 0 : index
    %2 = vector.load %arg1[%c1, %c0_3] : memref<2x32xf32, #tpu.memory_space<vmem>>, vector<1x32xf32>
    %cst = arith.constant dense<0.000000e+00> : vector<16xf32>
    %3 = vector.multi_reduction <add>, %0, %cst [1] : vector<16x32xf32> to vector<16xf32>
    %4 = vector.shape_cast %3 : vector<16xf32> to vector<16x1xf32>
    %cst_4 = arith.constant 3.200000e+01 : f32
    %5 = vector.broadcast %cst_4 : f32 to vector<16x1xf32>
    %6 = arith.divf %4, %5 : vector<16x1xf32>
    %7 = vector.broadcast %6 : vector<16x1xf32> to vector<16x32xf32>
    %8 = arith.subf %0, %7 : vector<16x32xf32>
    %9 = arith.mulf %8, %8 : vector<16x32xf32>
    %cst_5 = arith.constant dense<0.000000e+00> : vector<16xf32>
    %10 = vector.multi_reduction <add>, %9, %cst_5 [1] : vector<16x32xf32> to vector<16xf32>
    %11 = vector.shape_cast %10 : vector<16xf32> to vector<16x1xf32>
    %cst_6 = arith.constant 0.0322580636 : f32
    %12 = vector.broadcast %cst_6 : f32 to vector<16x1xf32>
    %13 = arith.mulf %11, %12 : vector<16x1xf32>
    %14 = math.sqrt %13 : vector<16x1xf32>
    %cst_7 = arith.constant 9.99999997E-7 : f32
    %15 = vector.broadcast %cst_7 : f32 to vector<16x1xf32>
    %16 = arith.addf %14, %15 : vector<16x1xf32>
    %17 = vector.broadcast %1 : vector<1x32xf32> to vector<16x32xf32>
    %18 = arith.mulf %17, %8 : vector<16x32xf32>
    %19 = vector.broadcast %16 : vector<16x1xf32> to vector<16x32xf32>
    %20 = arith.divf %18, %19 : vector<16x32xf32>
    %21 = vector.broadcast %2 : vector<1x32xf32> to vector<16x32xf32>
    %22 = arith.addf %20, %21 : vector<16x32xf32>
    %c0_8 = arith.constant 0 : index
    %c0_9 = arith.constant 0 : index
    %23 = vector.load %arg2[%c0_8, %c0_9] : memref<16x32xf32, #tpu.memory_space<vmem>>, vector<16x32xf32>
    tpu.vector_store %arg2[%c0_8, %c0_9], %22 {strides = array<i32>} : memref<16x32xf32, #tpu.memory_space<vmem>>, vector<16x32xf32>,
    return
  }
}

</mosaic_0001>

<bundles_post_ra>
// kernel: tpu_custom_call.1
= control target key start
LH: loop header
LB: loop body
LE: loop exit
PB: predicated region body
PF: predicated region fallthrough
CT: control target
= control target key end

     0   :  { %7 = vsyncpa [#allocation3], 0  ;;  %s226_s0 = inlined_call_operand.hbm [shape: f32[16,32], index: 0, kind: input, shape index: {}]   ;;  %s227_s1 = inlined_call_operand.vmem [shape: f32[2,32], index: 1, kind: input, shape index: {}]   ;;  %s228_s2 = inlined_call_operand.hbm [shape: f32[16,32], index: 2, kind: output, shape index: {}]  }
   0x1   :  { %8 = vsyncpa [#allocation4], 0  ;;  %s165_s9 = smov [#allocation2]   ;;  %s117_s13 = scalar_lea.hbm %s226_s0, 256 }
   0x2   :  { %s14_s10 = sshll.u32 %s165_s9, 4  ;;  %p118_p0 = scmp.ne.s32.totalorder %s226_s0, %s117_s13  ;;  %s15_s10 = int_to_ptr.vmem [resolvable:$true] %s14_s10 }
   0x3   :  { %p121_p1 = scmp.lt.u32.totalorder %s117_s13, %s226_s0 }
   0x5   :  { %p123_p2 = pnand %p121_p1, %p118_p0 }
   0x7   :  { %126 = shalt.err (!%p123_p2)
}
   0x8   :  { %s127_s18 = scalar_lea.vmem %s15_s10, 256  ;;  %p132_p4 = scmp.lt.s32.totalorder %s15_s10, %s15_s10 }
   0x9   :  { %p128_p3 = scmp.ne.s32.totalorder %s15_s10, %s127_s18  ;;  %p133_p5 = scmp.lt.s32.totalorder %s127_s18, %s127_s18 }
   0xb   :  { %p134_p6 = por %p133_p5, %p132_p4 }
   0xd   :  { %p135_p7 = pnand %p134_p6, %p128_p3 }
   0xf   :  { %138 = shalt.err (!%p135_p7)
}
  0x10   :  { %s166_s19 = smov 128   ;;  %s167_s20 = smov 8  }
  0x11   :  { %20 = dma.hbm_to_vmem [thread:$0]  %s226_s0, 256, %s15_s10, [#allocation3], %s166_s19, %s166_s19, %s167_s20  }
  0x12   :  { %161 = dma.done.wait [#allocation3], 256  }
  0x13   :  { %162 = vsyncadd [#allocation3], 4294967040  ;;  %vm30_vm0 = vcmask 261120   ;;  %v26_v0 = vld [vmem:[#allocation2] sm:$0xff]  ;;  %v27_v1 = vld [vmem:[#allocation2 + $0x8] sm:$0xff]  ;;  %s168_s26 = smov [#allocation5]  }
  0x14   :  { %v31_v2 = vsel %vm30_vm0, %v26_v0, 0.0  ;;  %v34_v3 = vsel %vm30_vm0, %v27_v1, 0.0  ;;  %v103_v30 = vld [vmem:[%s227_s1] ss:$0 sm:$0xff]  ;;  %v104_v33 = vld [vmem:[%s227_s1 + $0x1] ss:$0 sm:$0xff] }
  0x15   :  { %32 = vadd.xlane.f32.xlu0 %v31_v2  ;;  %s91_s27 = sshll.u32 %s168_s26, 4  ;;  %s92_s27 = int_to_ptr.vmem [resolvable:$true] %s91_s27 }
  0x16   :  { %s139_s28 = scalar_lea.vmem %s92_s27, 256  ;;  %p144_p9 = scmp.lt.s32.totalorder %s92_s27, %s92_s27 }
  0x17   :  { %p140_p8 = scmp.ne.s32.totalorder %s92_s27, %s139_s28  ;;  %p145_p10 = scmp.lt.s32.totalorder %s139_s28, %s139_s28 }
  0x19   :  { %35 = vadd.xlane.f32.xlu0 %v34_v3  ;;  %p146_p11 = por %p145_p10, %p144_p9 }
  0x1b   :  { %p147_p12 = pnand %p146_p11, %p140_p8 }
  0xa2   :  { %v33_v4 = vpop.xlane.xlu0 %32 }
  0xa3   :  { %v38_v5 = vmul.f32 0.03125, %v33_v4 }
  0xa5   :  { %v40_v6 = vsub.f32 %v26_v0, %v38_v5 }
  0xa6   :  { %v36_v7 = vpop.xlane.xlu0 %35 }
  0xa7   :  { %v39_v8 = vmul.f32 0.03125, %v36_v7  ;;  %v42_v9 = vmul.f32 %v40_v6, %v40_v6  ;;  %v72_v31 = vmul.f32 %v103_v30, %v40_v6 }
  0xa9   :  { %v41_v10 = vsub.f32 %v27_v1, %v39_v8  ;;  %v44_v11 = vsel %vm30_vm0, %v42_v9, 0.0 }
  0xaa   :  { %45 = vadd.xlane.f32.xlu1 %v44_v11 }
  0xab   :  { %v43_v12 = vmul.f32 %v41_v10, %v41_v10  ;;  %v73_v35 = vmul.f32 %v103_v30, %v41_v10 }
  0xad   :  { %v47_v13 = vsel %vm30_vm0, %v43_v12, 0.0 }
  0xae   :  { %48 = vadd.xlane.f32.xlu1 %v47_v13 }
 0x137   :  { %v46_v14 = vpop.xlane.xlu1 %45 }
 0x138   :  { %v50_v15 = vmul.f32 0.032258064, %v46_v14 }
 0x13a   :  { %109 = vrsqrt.f32 %v50_v15  ;;  %vm54_vm1 = vcmp.eq.f32.partialorder %v50_v15, inf  ;;  %v57_v20 = vand.u32 2147483648, %v50_v15  ;;  %vm56_vm2 = vcmp.eq.f32.partialorder %v50_v15, 0.0 }
 0x13b   :  { %v49_v16 = vpop.xlane.xlu1 %48 }
 0x13c   :  { %v51_v17 = vmul.f32 0.032258064, %v49_v16 }
 0x13e   :  { %111 = vrsqrt.f32 %v51_v17  ;;  %vm61_vm3 = vcmp.eq.f32.partialorder %v51_v17, inf  ;;  %v64_v26 = vand.u32 2147483648, %v51_v17  ;;  %vm63_vm4 = vcmp.eq.f32.partialorder %v51_v17, 0.0 }
 0x144   :  { %v110_v18 = vpop.eup %109 }
 0x145   :  { %v53_v19 = vmul.f32 %v110_v18, %v50_v15 }
 0x147   :  { %v55_v21 = vsel %vm54_vm1, %v50_v15, %v53_v19 }
 0x148   :  { %v112_v22 = vpop.eup %111  ;;  %v58_v23 = vsel %vm56_vm2, %v57_v20, %v55_v21 }
 0x149   :  { %v66_v24 = vadd.f32 1e-06, %v58_v23  ;;  %v60_v25 = vmul.f32 %v112_v22, %v51_v17 }
 0x14b   :  { %v62_v27 = vsel %vm61_vm3, %v51_v17, %v60_v25  ;;  %113 = vrcp.f32 %v66_v24 }
 0x14c   :  { %v65_v28 = vsel %vm63_vm4, %v64_v26, %v62_v27 }
 0x14d   :  { %v67_v29 = vadd.f32 1e-06, %v65_v28 }
 0x14f   :  { %115 = vrcp.f32 %v67_v29 }
 0x155   :  { %v114_v32 = vpop.eup %113 }
 0x156   :  { %v75_v34 = vmul.f32 %v114_v32, %v72_v31 }
 0x158   :  { %v82_v36 = vadd.f32 %v104_v33, %v75_v34 }
 0x159   :  { %v116_v37 = vpop.eup %115 }
 0x15a   :  { %v77_v38 = vmul.f32 %v116_v37, %v73_v35  ;;  %84 = vst.msk [vmem:[#allocation5] sm:$0xff] %vm30_vm0, %v82_v36 }
 0x15c   :  { %v83_v39 = vadd.f32 %v104_v33, %v77_v38 }
 0x15e   :  { %85 = vst.msk [vmem:[#allocation5 + $0x8] sm:$0xff] %vm30_vm0, %v83_v39 }
 0x15f   :  { %150 = shalt.err (!%p147_p12)
}
 0x160   :  { %s151_s30 = scalar_lea.hbm %s228_s2, 256 }
 0x161   :  { %p152_p13 = scmp.ne.s32.totalorder %s228_s2, %s151_s30  ;;  %p155_p0 = scmp.lt.u32.totalorder %s151_s30, %s228_s2 }
 0x163   :  { %p157_p1 = pnand %p155_p0, %p152_p13 }
 0x165   :  { %160 = shalt.err (!%p157_p1)
}
 0x166   :  { %97 = dma.vmem_to_hbm [thread:$0]  %s92_s27, 256, %s228_s2, [#allocation4], %s166_s19, %s166_s19, %s167_s20  }
 0x167   :  { %163 = dma.done.wait [#allocation4], 256  }
 0x168   :  { %164 = vsyncadd [#allocation4], 4294967040 }
 0x169   :  { %101 = vsyncpa [#allocation3], 1 }
 0x16a   :  { %102 = vsyncpa [#allocation4], 1 }

</bundles_post_ra>
